<compile_context>
chip_gen: v7x
topology: tpu7x:2x2x1
jax: 0.10.0
libtpu: 0.0.40
codegen_flags: <defaults>
</compile_context>

<pallas_src>
import jax
import jax.numpy as jnp
from jax.experimental import pallas as pl
from jax.experimental.pallas import tpu as pltpu


_TARGET_BUF_BYTES = 2 * 1024 * 1024   # ~2 MiB per streaming buffer per grid step


def _round_up(a, b):
    return ((a + b - 1) // b) * b


def _vmem_config():
    """(vmem_limit_bytes, tile_budget_bytes) tuned per TPU generation."""
    cap = 128 * 1024 * 1024
    try:
        info = pltpu.get_tpu_info()
        cap = int(getattr(info, "vmem_capacity_bytes", cap) or cap)
    except Exception:
        pass
    if cap <= 64 * 1024 * 1024:                       # v7x: 64 MiB per TensorCore
        return 40 * 1024 * 1024, 24 * 1024 * 1024
    return 100 * 1024 * 1024, 80 * 1024 * 1024        # v5e / v6e: 128 MiB


# ------------------------------- kernels -----------------------------------


def _se_fused_kernel(x_ref, wd_ref, bd_ref, wu_ref, bu_ref, o_ref):
    """Whole (tn, C, S) slab resident: pool -> gates -> scale; x read once from HBM.

    The spatial block covers the full S extent, so no column masking is needed.
    A ragged batch tail only produces garbage in its *own* rows (pool / matmuls /
    scale are all per-row), and those rows are dropped by the block writeback.
    """
    pooled = jnp.sum(x_ref[...], axis=-1, dtype=jnp.float32)                  # (tn, C)
    h = jnp.maximum(
        jnp.dot(pooled, wd_ref[...], preferred_element_type=jnp.float32) + bd_ref[...],
        0.0)
    g = jax.nn.sigmoid(
        jnp.dot(h, wu_ref[...], preferred_element_type=jnp.float32) + bu_ref[...])
    g = g.astype(o_ref.dtype)                                                 # packed multiply
    o_ref[...] = x_ref[...] * g[:, :, None]


# ------------------------------- wrapper -----------------------------------


def se_block(x, w_down, b_down, w_up, b_up, *, tile_budget_bytes=None,
             donate_input=False):
    """x: (N, C, D, H, W). Conv3d weights in PyTorch layout (out, in, 1, 1, 1)."""
    N, C, D, H, W = x.shape
    # F.avg_pool3d(inputs, kernel_size=inputs.size(3)) is a *global* pool only
    # when D == H == W (the way RepVGG uses it).
    assert D == H == W, "SEBlock's avg_pool3d(kernel_size=H) assumes cubic spatial dims"
    NI = w_down.shape[0]
    S = D * H * W
    itemsize = jnp.dtype(x.dtype).itemsize

    vmem_limit, budget = _vmem_config()
    if tile_budget_bytes is not None:
        budget = tile_budget_bytes

    # 1x1x1 Conv3d weights -> dense matrices, pre-transposed; fold 1/S into wd
    # so kernels accumulate a plain sum.
    wd = (w_down.reshape(NI, C).T * (1.0 / S)).astype(jnp.float32)   # (C, NI)
    wu = w_up.reshape(C, NI).T.astype(jnp.float32)                   # (NI, C)
    bd = b_down.reshape(1, NI).astype(jnp.float32)
    bu = b_up.reshape(1, C).astype(jnp.float32)

    # VMEM footprint of one batch row's (C, S) slab (sublane/lane padded).
    c_pad = _round_up(C, 8)
    s_lane = _round_up(S, 128)
    row_bytes = c_pad * s_lane * itemsize

    x3 = x.reshape(N, C, S)                       # contiguous collapse: free bitcast
    out_shape = jax.ShapeDtypeStruct((N, C, S), x.dtype)

    # Fused (read-once) path if the double-buffered in+out tiles fit at tn = 1.
    fused = 4 * row_bytes <= budget

    if fused:
        tn = min(max(1, _TARGET_BUF_BYTES // row_bytes),   # ~2 MiB per buffer
                 max(1, -(-N // 4)),                       # >= 4 grid steps when N allows
                 max(1, budget // (4 * row_bytes)),
                 N)
        out = pl.pallas_call(
            _se_fused_kernel,
            out_shape=out_shape,
            grid_spec=pltpu.PrefetchScalarGridSpec(
                num_scalar_prefetch=0,
                grid=(pl.cdiv(N, tn),),
                in_specs=[
                    pl.BlockSpec((tn, C, S), lambda n: (n, 0, 0)),   # batch tile (full S)
                    pl.BlockSpec((C, NI), lambda n: (0, 0)),         # wd (resident)
                    pl.BlockSpec((1, NI), lambda n: (0, 0)),         # bd
                    pl.BlockSpec((NI, C), lambda n: (0, 0)),         # wu
                    pl.BlockSpec((1, C), lambda n: (0, 0)),          # bu
                ],
                out_specs=pl.BlockSpec((tn, C, S), lambda n: (n, 0, 0)),
            ),
            compiler_params=pltpu.CompilerParams(
                dimension_semantics=("parallel",),
                vmem_limit_bytes=vmem_limit),
        )(x3, wd, bd, wu, bu)
        return out.reshape(N, C, D, H, W)

    # ---------------- two-pass path for large C*S ---------------------------
    target = max(1, min(_TARGET_BUF_BYTES, budget // 4))
    ts = max(128, (target // (c_pad * itemsize)) // 128 * 128)
    ts = min(ts, s_lane)
    tn2 = min(max(1, target // (c_pad * ts * itemsize)),
              max(1, -(-N // 4)),
              N)
    n_tiles = pl.cdiv(N, tn2)
    s_tiles = pl.cdiv(S, ts)

    def _pool_gate_kernel(x_ref, wd_ref, bd_ref, wu_ref, bu_ref, g_ref):
        """Pass 1: tiled spatial sum (masked ragged tail); gates on the last chunk."""
        s_idx = pl.program_id(1)
        last = pl.num_programs(1) - 1

        @pl.when(s_idx == 0)
        def _init():
            g_ref[...] = jnp.zeros_like(g_ref)

        @pl.when(s_idx != last)
        def _body():
            g_ref[...] += jnp.sum(x_ref[...], axis=-1, keepdims=True, dtype=jnp.float32)

        @pl.when(s_idx == last)
        def _tail():
            x_blk = x_ref[...]
            rem = S - s_idx * ts   # valid columns in this (possibly ragged) chunk
            col = jax.lax.broadcasted_iota(jnp.int32, x_blk.shape, 2)
            xm = jnp.where(col < rem, x_blk, jnp.zeros_like(x_blk))
            g_ref[...] += jnp.sum(xm, axis=-1, keepdims=True, dtype=jnp.float32)
            pooled = g_ref[...][:, :, 0]                                       # (tn, C)
            h = jnp.maximum(
                jnp.dot(pooled, wd_ref[...], preferred_element_type=jnp.float32)
                + bd_ref[...], 0.0)
            g = jax.nn.sigmoid(
                jnp.dot(h, wu_ref[...], preferred_element_type=jnp.float32) + bu_ref[...])
            g_ref[...] = g[:, :, None]

    def _scale_kernel(x_ref, g_ref, o_ref):
        """Pass 2: pure streaming multiply, out = x * gate (HBM-roofline bound)."""
        o_ref[...] = x_ref[...] * g_ref[...].astype(o_ref.dtype)

    gates = pl.pallas_call(
        _pool_gate_kernel,
        out_shape=jax.ShapeDtypeStruct((N, C, 1), jnp.float32),
        grid_spec=pltpu.PrefetchScalarGridSpec(
            num_scalar_prefetch=0,
            grid=(n_tiles, s_tiles),                 # reduction axis last
            in_specs=[
                pl.BlockSpec((tn2, C, ts), lambda n, s: (n, 0, s)),
                pl.BlockSpec((C, NI), lambda n, s: (0, 0)),
                pl.BlockSpec((1, NI), lambda n, s: (0, 0)),
                pl.BlockSpec((NI, C), lambda n, s: (0, 0)),
                pl.BlockSpec((1, C), lambda n, s: (0, 0)),
            ],
            out_specs=pl.BlockSpec((tn2, C, 1), lambda n, s: (n, 0, 0)),
        ),
        compiler_params=pltpu.CompilerParams(
            dimension_semantics=("parallel", "arbitrary"),
            vmem_limit_bytes=vmem_limit),
    )(x3, wd, bd, wu, bu)

    alias_kwargs = {"input_output_aliases": {0: 0}} if donate_input else {}
    out = pl.pallas_call(
        _scale_kernel,
        out_shape=out_shape,
        grid_spec=pltpu.PrefetchScalarGridSpec(
            num_scalar_prefetch=0,
            grid=(n_tiles, s_tiles),
            in_specs=[
                pl.BlockSpec((tn2, C, ts), lambda n, s: (n, 0, s)),
                pl.BlockSpec((tn2, C, 1), lambda n, s: (n, 0, 0)),
            ],
            out_specs=pl.BlockSpec((tn2, C, ts), lambda n, s: (n, 0, s)),
        ),
        compiler_params=pltpu.CompilerParams(
            dimension_semantics=("parallel", "parallel"),
            vmem_limit_bytes=vmem_limit),
        **alias_kwargs,
    )(x3, gates)

    return out.reshape(N, C, D, H, W)


# ------------------------------ reference ----------------------------------


def se_block_ref(x, w_down, b_down, w_up, b_up):
    """Pure-JAX reference mirroring the PyTorch forward."""
    N, C = x.shape[0], x.shape[1]
    NI = w_down.shape[0]
    pooled = jnp.mean(x, axis=(2, 3, 4))                        # avg_pool3d -> (N, C)
    h = jnp.maximum(pooled @ w_down.reshape(NI, C).T + b_down, 0.0)
    g = jax.nn.sigmoid(h @ w_up.reshape(C, NI).T + b_up)
    return x * g[:, :, None, None, None]


if __name__ == "__main__":
    key = jax.random.PRNGKey(0)
    kx1, kx2, kwd, kbd, kwu, kbu = jax.random.split(key, 6)

    N, C, NI = 2, 8, 4
    w_down = jax.random.normal(kwd, (NI, C, 1, 1, 1), dtype=jnp.float32) * 0.1
    b_down = jax.random.normal(kbd, (NI,), dtype=jnp.float32) * 0.1
    w_up = jax.random.normal(kwu, (C, NI, 1, 1, 1), dtype=jnp.float32) * 0.1
    b_up = jax.random.normal(kbu, (C,), dtype=jnp.float32) * 0.1

    # 1) Fused (read-once, whole-slab) path: spatial edge 8 -> S = 512.
    x1 = jax.random.normal(kx1, (N, C, 8, 8, 8), dtype=jnp.float32)
    out1 = jax.block_until_ready(se_block(x1, w_down, b_down, w_up, b_up))
    ref1 = se_block_ref(x1, w_down, b_down, w_up, b_up)
    assert out1.shape == x1.shape
    assert jnp.allclose(out1, ref1, atol=1e-5, rtol=1e-5), "fused path mismatch"

    # 2) Two-pass (pool+gate, then stream) path: spatial edge 7 -> S = 343
    #    (non-128-multiple -> exercises in-kernel ragged-chunk masking);
    #    a tiny budget forces spatial tiling and the two-pass fallback.
    x2 = jax.random.normal(kx2, (N, C, 7, 7, 7), dtype=jnp.float32)
    out2 = jax.block_until_ready(
        se_block(x2, w_down, b_down, w_up, b_up, tile_budget_bytes=32 * 1024))
    ref2 = se_block_ref(x2, w_down, b_down, w_up, b_up)
    assert out2.shape == x2.shape
    assert jnp.allclose(out2, ref2, atol=1e-5, rtol=1e-5), "two-pass path mismatch"

    print("KERNEL_OK")
</pallas_src>

<mosaic_0001>
module attributes {stable_mosaic.version = 11 : i64} {
  func.func @_se_fused_kernel(%arg0: i32, %arg1: memref<1x8x512xf32, #tpu.memory_space<vmem>>, %arg2: memref<8x4xf32, #tpu.memory_space<vmem>>, %arg3: memref<1x4xf32, #tpu.memory_space<vmem>>, %arg4: memref<4x8xf32, #tpu.memory_space<vmem>>, %arg5: memref<1x8xf32, #tpu.memory_space<vmem>>, %arg6: memref<1x8x512xf32, #tpu.memory_space<vmem>>) attributes {dimension_semantics = [#tpu.dimension_semantics<parallel>], iteration_bounds = array<i64: 2>, scalar_prefetch = 0 : i64, scratch_operands = 0 : i64, tpu.core_type = #tpu.core_type<tc>, window_params = [{transform_indices = @transform_0, window_bounds = array<i64: 1, 8, 512>}, {pipeline_mode = #tpu.pipeline_mode<synchronous>, transform_indices = @transform_1, window_bounds = array<i64: 8, 4>}, {pipeline_mode = #tpu.pipeline_mode<synchronous>, transform_indices = @transform_2, window_bounds = array<i64: 1, 4>}, {pipeline_mode = #tpu.pipeline_mode<synchronous>, transform_indices = @transform_3, window_bounds = array<i64: 4, 8>}, {pipeline_mode = #tpu.pipeline_mode<synchronous>, transform_indices = @transform_4, window_bounds = array<i64: 1, 8>}, {transform_indices = @transform_5, window_bounds = array<i64: 1, 8, 512>}]} {
    %c0 = arith.constant 0 : index
    %c0_0 = arith.constant 0 : index
    %c0_1 = arith.constant 0 : index
    %0 = vector.load %arg1[%c0, %c0_0, %c0_1] : memref<1x8x512xf32, #tpu.memory_space<vmem>>, vector<1x8x512xf32>
    %cst = arith.constant dense<0.000000e+00> : vector<1x8xf32>
    %1 = vector.multi_reduction <add>, %0, %cst [2] : vector<1x8x512xf32> to vector<1x8xf32>
    %c0_2 = arith.constant 0 : index
    %c0_3 = arith.constant 0 : index
    %2 = vector.load %arg2[%c0_2, %c0_3] : memref<8x4xf32, #tpu.memory_space<vmem>>, vector<8x4xf32>
    %cst_4 = arith.constant dense<0.000000e+00> : vector<1x4xf32>
    %3 = tpu.matmul %1, %2, %cst_4 {dimension_numbers = #tpu.dot_dimension_numbers<[1], [0], [0], [1], [0, 0, 1, 1], [], []>} : vector<1x8xf32>, vector<8x4xf32>, vector<1x4xf32> -> vector<1x4xf32>
    %c0_5 = arith.constant 0 : index
    %c0_6 = arith.constant 0 : index
    %4 = vector.load %arg3[%c0_5, %c0_6] : memref<1x4xf32, #tpu.memory_space<vmem>>, vector<1x4xf32>
    %5 = arith.addf %3, %4 : vector<1x4xf32>
    %cst_7 = arith.constant 0.000000e+00 : f32
    %6 = vector.broadcast %cst_7 : f32 to vector<1x4xf32>
    %7 = arith.maximumf %5, %6 : vector<1x4xf32>
    %c0_8 = arith.constant 0 : index
    %c0_9 = arith.constant 0 : index
    %8 = vector.load %arg4[%c0_8, %c0_9] : memref<4x8xf32, #tpu.memory_space<vmem>>, vector<4x8xf32>
    %cst_10 = arith.constant dense<0.000000e+00> : vector<1x8xf32>
    %9 = tpu.matmul %7, %8, %cst_10 {dimension_numbers = #tpu.dot_dimension_numbers<[1], [0], [0], [1], [0, 0, 1, 1], [], []>} : vector<1x4xf32>, vector<4x8xf32>, vector<1x8xf32> -> vector<1x8xf32>
    %c0_11 = arith.constant 0 : index
    %c0_12 = arith.constant 0 : index
    %10 = vector.load %arg5[%c0_11, %c0_12] : memref<1x8xf32, #tpu.memory_space<vmem>>, vector<1x8xf32>
    %11 = arith.addf %9, %10 : vector<1x8xf32>
    %12 = arith.negf %11 : vector<1x8xf32>
    %13 = math.exp %12 : vector<1x8xf32>
    %cst_13 = arith.constant 1.000000e+00 : f32
    %14 = vector.broadcast %cst_13 : f32 to vector<1x8xf32>
    %15 = arith.addf %14, %13 : vector<1x8xf32>
    %16 = arith.divf %14, %15 : vector<1x8xf32>
    %c0_14 = arith.constant 0 : index
    %c0_15 = arith.constant 0 : index
    %c0_16 = arith.constant 0 : index
    %17 = vector.load %arg1[%c0_14, %c0_15, %c0_16] : memref<1x8x512xf32, #tpu.memory_space<vmem>>, vector<1x8x512xf32>
    %18 = vector.shape_cast %16 : vector<1x8xf32> to vector<1x8x1xf32>
    %19 = vector.broadcast %18 : vector<1x8x1xf32> to vector<1x8x512xf32>
    %20 = arith.mulf %17, %19 : vector<1x8x512xf32>
    %c0_17 = arith.constant 0 : index
    %c0_18 = arith.constant 0 : index
    %c0_19 = arith.constant 0 : index
    %21 = vector.load %arg6[%c0_17, %c0_18, %c0_19] : memref<1x8x512xf32, #tpu.memory_space<vmem>>, vector<1x8x512xf32>
    tpu.vector_store %arg6[%c0_17, %c0_18, %c0_19], %20 {strides = array<i32>} : memref<1x8x512xf32, #tpu.memory_space<vmem>>, vector<1x8x512xf32>,
    return
  }
  func.func @transform_0(%arg0: i32) -> (i32, i32, i32) {
    %c0_i32 = arith.constant 0 : i32
    %c0_i32_0 = arith.constant 0 : i32
    %c0_i32_1 = arith.constant 0 : i32
    return %arg0, %c0_i32, %c0_i32_0 : i32, i32, i32
  }
  func.func @transform_1(%arg0: i32) -> (i32, i32) {
    %c0_i32 = arith.constant 0 : i32
    %c0_i32_0 = arith.constant 0 : i32
    %c0_i32_1 = arith.constant 0 : i32
    return %c0_i32, %c0_i32_0 : i32, i32
  }
  func.func @transform_2(%arg0: i32) -> (i32, i32) {
    %c0_i32 = arith.constant 0 : i32
    %c0_i32_0 = arith.constant 0 : i32
    %c0_i32_1 = arith.constant 0 : i32
    return %c0_i32, %c0_i32_0 : i32, i32
  }
  func.func @transform_3(%arg0: i32) -> (i32, i32) {
    %c0_i32 = arith.constant 0 : i32
    %c0_i32_0 = arith.constant 0 : i32
    %c0_i32_1 = arith.constant 0 : i32
    return %c0_i32, %c0_i32_0 : i32, i32
  }
  func.func @transform_4(%arg0: i32) -> (i32, i32) {
    %c0_i32 = arith.constant 0 : i32
    %c0_i32_0 = arith.constant 0 : i32
    %c0_i32_1 = arith.constant 0 : i32
    return %c0_i32, %c0_i32_0 : i32, i32
  }
  func.func @transform_5(%arg0: i32) -> (i32, i32, i32) {
    %c0_i32 = arith.constant 0 : i32
    %c0_i32_0 = arith.constant 0 : i32
    %c0_i32_1 = arith.constant 0 : i32
    return %arg0, %c0_i32, %c0_i32_0 : i32, i32, i32
  }
}

</mosaic_0001>

<bundles_post_ra>
// kernel: tpu_custom_call.1
= control target key start
LH: loop header
LB: loop body
LE: loop exit
PB: predicated region body
PF: predicated region fallthrough
CT: control target
= control target key end

     0   :  { %10 = vsyncpa [#allocation3], 0  ;;  %s1286_s0 = inlined_call_operand.hbm [shape: f32[2,8,512], index: 0, kind: input, shape index: {}]   ;;  %s1287_s1 = inlined_call_operand.hbm [shape: f32[8,4], index: 1, kind: input, shape index: {}]   ;;  %s1288_s2 = inlined_call_operand.hbm [shape: f32[1,4], index: 2, kind: input, shape index: {}]   ;;  %s1289_s3 = inlined_call_operand.hbm [shape: f32[4,8], index: 3, kind: input, shape index: {}]   ;;  %s1290_s4 = inlined_call_operand.hbm [shape: f32[1,8], index: 4, kind: input, shape index: {}]   ;;  %s1291_s5 = inlined_call_operand.hbm [shape: f32[2,8,512], index: 5, kind: output, shape index: {}]  }
   0x1   :  { %12 = vsyncpa [#allocation3 + $0x1], 0 }
   0x2   :  { %13 = vsyncpa [#allocation6], 0 }
   0x3   :  { %14 = vsyncpa [#allocation9], 0 }
   0x4   :  { %15 = vsyncpa [#allocation4], 0 }
   0x5   :  { %17 = vsyncpa [#allocation4 + $0x1], 0  ;;  %s998_s18 = smov 0   ;;  %s1000_s19 = smov 0  }
   0x6   :  { %s1002_s20 = smov 0   ;;  %s1004_s21 = smov 0  }
   0x7 LB: > { %s960_s22 = smov [#allocation5]   ;;  %s1019_s24 = sadd.s32 4294967295, %s958_s21   ;;  %s958_s21 = sphi %s1004_s21, %s1315_s21   ;;  %s954_s20 = sphi %s1002_s20, %s1314_s20   ;;  %s950_s19 = sphi %s1000_s19, %s1313_s19   ;;  %s946_s18 = sphi %s998_s18, %s1312_s18  }
   0x8   : > { %s177_s23 = sshll.u32 %s960_s22, 4  ;;  %p608_p0 = scmp.ge.s32.totalorder %s958_s21, 1  ;;  %s1024_s23 = int_to_ptr.vmem [resolvable:$true] %s177_s23 }
   0x9   : > { %p1292_p1 = scmp.eq.s32.totalorder %s1019_s24, 0  ;;  %p164_p2 = scmp.lt.s32.totalorder %s958_s21, 3 }
   0xa   : > { %s961_s26 = smov [#allocation8]   ;;  %s962_s28 = smov [#allocation7]  }
   0xb   : > { %p1026_p3 = pnand %p608_p0, %p164_p2  ;;  %s199_s27 = sshll.u32 %s961_s26, 4  ;;  %s1033_s27 = int_to_ptr.vmem [resolvable:$true] %s199_s27 }
   0xc   : > { %s188_s29 = sshll.u32 %s962_s28, 4  ;;  %s963_s6 = smov [#allocation10]   ;;  %s1041_s29 = int_to_ptr.vmem [resolvable:$true] %s188_s29 }
   0xd   : > { %s1295_s25 = scalar_select %p1026_p3, 1, 0 }
   0xe   : > { %p669_p5 = pneg %p1026_p3  ;;  %s1043_s7 = sshll.u32 %s963_s6, 4  ;;  %s211_s7 = int_to_ptr.vmem [resolvable:$true] %s1043_s7 }
   0xf   : > { %s742_s10 = scalar_lea.hbm %s1287_s1, 128 }
  0x10   : > { %p1037_p6 = pnand %p669_p5, %p1292_p1  ;;  %p743_p7 = scmp.ne.s32.totalorder %s1287_s1, %s742_s10 }
  0x11   : > { %p749_p11 = scmp.lt.u32.totalorder %s742_s10, %s1287_s1 }
  0x12   : > { %p1053_p8 = pneg %p1037_p6 }
  0x14   : > { %p745_p9 = pnand %p1053_p8, %p743_p7 }
  0x16   : > { %p746_p10 = pneg %p745_p9 }
  0x18   : > { %p751_p12 = pnand %p749_p11, %p746_p10 }
  0x1a   : > { %754 = shalt.err (!%p751_p12)
}
  0x1b   : > { %s755_s16 = scalar_lea.vmem %s1024_s23, 128  ;;  %p763_p5 = scmp.lt.s32.totalorder %s1024_s23, %s1024_s23 }
  0x1c   : > { %p756_p13 = scmp.ne.s32.totalorder %s1024_s23, %s755_s16  ;;  %p764_p4 = scmp.lt.s32.totalorder %s755_s16, %s755_s16 }
  0x1e   : > { %p758_p0 = pnand %p756_p13, %p1053_p8  ;;  %p765_p7 = por %p764_p4, %p763_p5 }
  0x20   : > { %p759_p2 = pneg %p758_p0 }
  0x22   : > { %p766_p9 = pnand %p765_p7, %p759_p2 }
  0x24   : > { %769 = shalt.err (!%p766_p9)
}
  0x25   : > { %672 = dma.hbm_to_vmem [thread:$0]  (!%p1037_p6), %s1287_s1, 128, %s1024_s23, [#allocation6]  }
  0x26   : > { %s770_s6 = scalar_lea.hbm %s1289_s3, 64 }
  0x27   : > { %p771_p10 = scmp.ne.s32.totalorder %s1289_s3, %s770_s6  ;;  %p777_p12 = scmp.lt.u32.totalorder %s770_s6, %s1289_s3 }
  0x29   : > { %p773_p4 = pnand %p771_p10, %p1053_p8 }
  0x2b   : > { %p774_p11 = pneg %p773_p4 }
  0x2d   : > { %p779_p13 = pnand %p777_p12, %p774_p11 }
  0x2f   : > { %782 = shalt.err (!%p779_p13)
}
  0x30   : > { %s783_s23 = scalar_lea.vmem %s1033_s27, 64  ;;  %p791_p7 = scmp.lt.s32.totalorder %s1033_s27, %s1033_s27 }
  0x31   : > { %p784_p0 = scmp.ne.s32.totalorder %s1033_s27, %s783_s23  ;;  %p792_p9 = scmp.lt.s32.totalorder %s783_s23, %s783_s23 }
  0x33   : > { %p786_p2 = pnand %p784_p0, %p1053_p8  ;;  %p793_p10 = por %p792_p9, %p791_p7 }
  0x35   : > { %p787_p5 = pneg %p786_p2 }
  0x37   : > { %p794_p4 = pnand %p793_p10, %p787_p5 }
  0x39   : > { %797 = shalt.err (!%p794_p4)
}
  0x3a   : > { %678 = dma.hbm_to_vmem [thread:$0]  (!%p1037_p6), %s1289_s3, 64, %s1033_s27, [#allocation9]  }
  0x3b   : > { %s798_s17 = scalar_lea.hbm %s1288_s2, 16 }
  0x3c   : > { %p799_p11 = scmp.ne.s32.totalorder %s1288_s2, %s798_s17  ;;  %p805_p0 = scmp.lt.u32.totalorder %s798_s17, %s1288_s2 }
  0x3e   : > { %p801_p12 = pnand %p799_p11, %p1053_p8 }
  0x40   : > { %p802_p13 = pneg %p801_p12 }
  0x42   : > { %p807_p2 = pnand %p805_p0, %p802_p13 }
  0x44   : > { %810 = shalt.err (!%p807_p2)
}
  0x45   : > { %s811_s27 = scalar_lea.vmem %s1041_s29, 16  ;;  %s818_s8 = scalar_lea.vmem %s1041_s29, 32 }
  0x46   : > { %p812_p5 = scmp.ne.s32.totalorder %s1041_s29, %s811_s27  ;;  %p819_p10 = scmp.lt.s32.totalorder %s1041_s29, %s1041_s29 }
  0x47   : > { %p820_p4 = scmp.lt.s32.totalorder %s818_s8, %s811_s27 }
  0x48   : > { %p814_p7 = pnand %p812_p5, %p1053_p8 }
  0x49   : > { %p821_p11 = por %p820_p4, %p819_p10 }
  0x4a   : > { %p815_p9 = pneg %p814_p7 }
  0x4c   : > { %p822_p12 = pnand %p821_p11, %p815_p9 }
  0x4e   : > { %825 = shalt.err (!%p822_p12)
}
  0x4f   : > { %675 = dma.hbm_to_vmem [thread:$0]  (!%p1037_p6), %s1288_s2, 16, %s1041_s29, [#allocation6]  }
  0x50   : > { %s826_s12 = scalar_lea.hbm %s1290_s4, 16 }
  0x51   : > { %p827_p13 = scmp.ne.s32.totalorder %s1290_s4, %s826_s12  ;;  %p833_p5 = scmp.lt.u32.totalorder %s826_s12, %s1290_s4 }
  0x53   : > { %p829_p0 = pnand %p827_p13, %p1053_p8 }
  0x55   : > { %p830_p2 = pneg %p829_p0 }
  0x57   : > { %p835_p7 = pnand %p833_p5, %p830_p2 }
  0x59   : > { %838 = shalt.err (!%p835_p7)
}
  0x5a   : > { %s839_s22 = scalar_lea.vmem %s211_s7, 16  ;;  %s846_s29 = scalar_lea.vmem %s211_s7, 32 }
  0x5b   : > { %p840_p9 = scmp.ne.s32.totalorder %s211_s7, %s839_s22  ;;  %p847_p11 = scmp.lt.s32.totalorder %s211_s7, %s211_s7 }
  0x5c   : > { %p848_p12 = scmp.lt.s32.totalorder %s846_s29, %s839_s22 }
  0x5d   : > { %p842_p10 = pnand %p840_p9, %p1053_p8 }
  0x5e   : > { %p849_p1 = por %p848_p12, %p847_p11 }
  0x5f   : > { %p843_p4 = pneg %p842_p10 }
  0x61   : > { %p850_p3 = pnand %p849_p1, %p843_p4 }
  0x63   : > { %853 = shalt.err (!%p850_p3)
}
  0x64   : > { %681 = dma.hbm_to_vmem [thread:$0]  (!%p1037_p6), %s1290_s4, 16, %s211_s7, [#allocation9]  }
  0x65   : > { %s607_s13 = sadd.s32 4294967294, %s958_s21   ;;  %s1142_s30 = sadd.s32 1, %s958_s21  }
  0x66   : > { %s27_s6 = ssub.s32 %s958_s21, %s1142_s30  ;;  %s30_s27 = sadd.s32 1, %s954_s20 }
  0x67   : > { %p28_p1 = scmp.eq.s32.totalorder %s27_s6, 0  ;;  %p37_p3 = scmp.ne.s32.totalorder %s954_s20, %s950_s19 }
  0x68   : > { %p38_p8 = scmp.eq.s32.totalorder %s958_s21, 0  ;;  %p43_p13 = scmp.ne.s32.totalorder %s950_s19, %s946_s18 }
  0x69   : > { %s1153_s8 = scalar_select %p28_p1, %s954_s20, %s30_s27  }
  0x6a   : > { %p1155_p0 = por %p38_p8, %p37_p3  ;;  %p1299_p2 = scmp.eq.s32.totalorder %s1019_s24, 0 }
  0x6b   : > { %p151_p5 = scmp.eq.s32.totalorder %s1019_s24, 1  ;;  %p157_p7 = scmp.eq.s32.totalorder %s607_s13, 1 }
  0x6c   : > { %p1161_p6 = por %p1299_p2, %p43_p13  ;;  %p694_p9 = scmp.lt.s32.totalorder %s958_s21, 2 }
  0x6d   : > { %s221_s10 = sand.u32 1, %s954_s20   ;;  %p1168_p10 = por %p151_p5, %p37_p3 }
  0x6e   : > { %p1172_p4 = por %p157_p7, %p43_p13  ;;  %s614_s12 = sshll.u32 %s221_s10, 5 }
  0x6f   : > { %s1301_s11 = scalar_select %p1168_p10, 1, 0 }
  0x70   : > { %s1302_s23 = scalar_select %p1172_p4, 1, 0 }
  0x71   : > { %s633_s14 = sshll.u32 %s958_s21, 9  ;;  %s225_s22 = scalar_lea.vmem [#allocation2], %s614_s12 }
  0x72   : > { %s1180_s17 = scalar_lea.hbm %s1286_s0, %s633_s14  ;;  %s233_s29 = sshll.u32 %s225_s22, 4  ;;  %s1182_s29 = int_to_ptr.vmem [resolvable:$true] %s233_s29 }
  0x73   : > { %p1186_p11 = pnand %p694_p9, %p1155_p0  ;;  %s222_s28 = scalar_lea.sflag [#allocation3], %s221_s10 }
  0x74   : > { %s854_s13 = scalar_lea.hbm %s1180_s17, 512  ;;  %s859_s12 = scalar_lea.hbm %s1286_s0, 1024 }
  0x75   : > { %p855_p12 = scmp.ne.s32.totalorder %s1180_s17, %s854_s13  ;;  %p856_p1 = pneg %p1186_p11 }
  0x76   : > { %p860_p13 = scmp.lt.u32.totalorder %s1180_s17, %s1286_s0  ;;  %p861_p0 = scmp.lt.u32.totalorder %s859_s12, %s854_s13 }
  0x77   : > { %p857_p3 = pnand %p856_p1, %p855_p12  ;;  %p863_p5 = scmp.lt.u32.totalorder %s854_s13, %s1180_s17 }
  0x78   : > { %p862_p2 = por %p861_p0, %p860_p13 }
  0x79   : > { %p858_p8 = pneg %p857_p3 }
  0x7a   : > { %p864_p7 = por %p863_p5, %p862_p2 }
  0x7c   : > { %p865_p9 = pnand %p864_p7, %p858_p8 }
  0x7e   : > { %868 = shalt.err (!%p865_p9)
}
  0x7f   : > { %s869_s10 = scalar_lea.vmem %s1182_s29, 512  ;;  %s964_s15 = smov [#allocation2]  }
  0x80   : > { %p870_p12 = scmp.ne.s32.totalorder %s1182_s29, %s869_s10  ;;  %s874_s16 = sshll.u32 %s964_s15, 4  ;;  %s875_s16 = int_to_ptr.vmem [resolvable:$false] %s874_s16 }
  0x81   : > { %s876_s22 = scalar_lea.vmem %s875_s16, 1024  ;;  %p877_p10 = scmp.lt.s32.totalorder %s1182_s29, %s875_s16 }
  0x82   : > { %p872_p3 = pnand %p870_p12, %p856_p1  ;;  %p878_p13 = scmp.lt.s32.totalorder %s876_s22, %s869_s10 }
  0x84   : > { %p873_p4 = pneg %p872_p3  ;;  %p879_p0 = por %p878_p13, %p877_p10 }
  0x86   : > { %p880_p2 = pnand %p879_p0, %p873_p4 }
  0x88   : > { %883 = shalt.err (!%p880_p2)
}
  0x89   : > { %685 = dma.hbm_to_vmem [thread:$0]  (!%p1186_p11), %s1180_s17, 512, %s1182_s29, %s222_s28  }
  0x8a   : > { %p1304_p8 = scmp.ne.s32.totalorder %s1295_s25, 0 }
  0x8b   : > { %s1218_s13 = sand.u32 (!%p1304_p8), 1, %s950_s19  }
  0x8c   : > { %242 = sbr.rel (%p1304_p8) target bundleno = 896 (0x380), region = 40  ;;  %s618_s6 = sshll.u32 (!%p1304_p8), %s1218_s13, 5 }
  0x8d   : > { %s245_s27 = scalar_lea.sflag (!%p1304_p8), [#allocation3], %s1218_s13  ;;  %s248_s12 = scalar_lea.vmem (!%p1304_p8), [#allocation2], %s618_s6 }
  0x93   : > { %929 = dma.done.wait (%p1161_p6), %s245_s27, 512  }
  0x94   : > { %931 = vsyncadd (%p1161_p6), %s245_s27, 4294966784  ;;  %p1305_p10 = scmp.eq.s32.totalorder %s1019_s24, 0 }
  0x96   : > { %933 = dma.done.wait (%p1305_p10), [#allocation6], 144   ;;  %p1306_p4 = pmov %p1305_p10 }
  0x98   : > { %935 = vsyncadd (%p1306_p4), [#allocation6], 4294967152  ;;  %p1307_p11 = pmov %p1306_p4 }
  0x99   : > { %p1308_p1 = pmov %p1306_p4 }
  0x9a   : > { %937 = dma.done.wait (%p1307_p11), [#allocation9], 80  }
  0x9b   : > { %939 = vsyncadd (%p1308_p1), [#allocation9], 4294967216  ;;  %v291_v0 = vld [vmem:[%s248_s12] sm:$0xff]  ;;  %v292_v1 = vld [vmem:[%s248_s12 + $0x8] sm:$0xff]  ;;  %v965_v7 = vmov 0.0   ;;  %vm966_vm0 = vmmov 0   ;;  %v303_v9 = vlaneseq }
  0x9c   : > { %v293_v2 = vld [vmem:[%s248_s12 + $0x10] sm:$0xff]  ;;  %v295_v3 = vadd.f32 %v292_v1, %v291_v0  ;;  %v294_v4 = vld [vmem:[%s248_s12 + $0x18] sm:$0xff]  ;;  %639 = vmatprep.subr.mxu0 %v965_v7  ;;  %v300_v8 = vld [vmem:[#allocation5] sm:$0xff]  ;;  %644 = vmatprep.subr.mxu1 %v965_v7  ;;  %vm309_vm1 = vcmask 64512   ;;  %vm389_vm2 = vcmask 1043456   ;;  %vm385_vm3 = vcmask 31744  }
  0x9d   : > { %640 = vmatpush3.msra.mxu0 %v300_v8  ;;  %641 = vmatprep.mubr.msk.f32.mxu0 %vm966_vm0, %v965_v7  ;;  %v304_v10 = vand.u32 127, %v303_v9  ;;  %v306_v11 = vshrl.u32 %v303_v9, 7  ;;  %v383_v15 = vld [vmem:[#allocation8] sm:$0xf]  ;;  %v301_v16 = vld [vmem:[#allocation7] sm:$0x1] }
  0x9e   : > { %v296_v5 = vadd.f32 %v295_v3, %v293_v2  ;;  %646 = vmatprep.mubr.msk.f32.mxu1 %vm966_vm0, %v965_v7  ;;  %645 = vmatpush3.msk.msra.mxu1 %vm389_vm2, %v383_v15  ;;  %v384_v21 = vld [vmem:[#allocation10] sm:$0x1]  ;;  %s634_s25 = sshll.u32 %s1019_s24, 9  ;;  %s290_s7 = scalar_lea.vmem [#allocation11], %s618_s6 }
  0x9f   : > { %v307_v12 = vsub.s32 %v304_v10, %v306_v11  ;;  %v471_v28 = vsub.s32 0, %v306_v11  ;;  %s499_s17 = sshll.u32 %s290_s7, 4  ;;  %s1242_s28 = scalar_lea.hbm %s1291_s5, %s634_s25  ;;  %s1244_s17 = int_to_ptr.vmem [resolvable:$true] %s499_s17 }
  0xa0   : > { %v297_v6 = vadd.f32 %v296_v5, %v294_v4  ;;  %s485_s24 = scalar_lea.sflag [#allocation4], %s1218_s13  ;;  %s884_s9 = scalar_lea.vmem %s1244_s17, 512 }
  0xa1   : > { %p885_p6 = scmp.ne.s32.totalorder %s1244_s17, %s884_s9  ;;  %p1309_p5 = scmp.ne.s32.totalorder %s1301_s11, 0 }
  0xa2   : > { %298 = vadd.xlane.f32.xlu0 %v297_v6  ;;  %s967_s14 = smov [#allocation11]  }
  0xa3   : > { %p886_p7 = pnand %p885_p6, %p1309_p5  ;;  %s888_s10 = sshll.u32 %s967_s14, 4  ;;  %s889_s10 = int_to_ptr.vmem [resolvable:$false] %s888_s10 }
  0xa4   : > { %s890_s15 = scalar_lea.vmem %s889_s10, 1024  ;;  %p891_p12 = scmp.lt.s32.totalorder %s1244_s17, %s889_s10 }
  0xa5   : > { %p887_p9 = pneg %p886_p7  ;;  %p892_p3 = scmp.lt.s32.totalorder %s890_s15, %s884_s9 }
  0xa7   : > { %p893_p13 = por %p892_p3, %p891_p12 }
  0xa9   : > { %p894_p0 = pnand %p893_p13, %p887_p9 }
 0x12f   : > { %v299_v13 = vpop.xlane.xlu0 %298 }
 0x130   : > { %v308_v14 = vrot.slane %v299_v13, %v307_v12 }
 0x132   : > { %642 = vmatmul.mubr.msk.f32.vlgmr.msra.gmra.mrb[0].mxu0 %vm309_vm1, %v308_v14 }
 0x205   : > { %v378_v17 = vpop.f32.mrb[0].mxu0 }
 0x206   : > { %v379_v18 = vadd.f32 %v378_v17, %v301_v16  ;;  %v643_v19 = vpop.f32.mrb[1].mxu0 }
 0x208   : > { %v382_v20 = vmax.f32 %v379_v18, 0.0 }
 0x20a   : > { %647 = vmatmul.mubr.msk.f32.vlgmr.msra.gmra.mrb[0].mxu1 %vm385_vm3, %v382_v20 }
 0x2dd   : > { %v459_v22 = vpop.f32.mrb[0].mxu1 }
 0x2de   : > { %v460_v23 = vadd.f32 %v459_v22, %v384_v21  ;;  %v648_v24 = vpop.f32.mrb[1].mxu1 }
 0x2e0   : > { %v627_v25 = vmul.f32 -1.442695, %v460_v23 }
 0x2e2   : > { %738 = vpow2.f32 %v627_v25 }
 0x2ec   : > { %v739_v26 = vpop.eup %738 }
 0x2ed   : > { %v466_v27 = vadd.f32 1.0, %v739_v26 }
 0x2ef   : > { %740 = vrcp.f32 %v466_v27 }
 0x2f9   : > { %v741_v29 = vpop.eup %740 }
 0x2fa   : > { %v472_v30 = vrot.slane %v741_v29, %v471_v28 }
 0x2fc   : > { %474 = vbcast.lane.b32.xlu0 %v472_v30, 256 }
 0x36e   : > { %v475_v31 = vpop.permute.xlu0 %474 }
 0x36f   : > { %v476_v32 = vmul.f32 %v475_v31, %v291_v0  ;;  %v477_v33 = vmul.f32 %v475_v31, %v292_v1  ;;  %v478_v34 = vmul.f32 %v475_v31, %v293_v2  ;;  %v479_v35 = vmul.f32 %v475_v31, %v294_v4 }
 0x371   : > { %480 = vst [vmem:[%s290_s7] sm:$0xff] %v476_v32  ;;  %481 = vst [vmem:[%s290_s7 + $0x8] sm:$0xff] %v477_v33 }
 0x372   : > { %482 = vst [vmem:[%s290_s7 + $0x10] sm:$0xff] %v478_v34  ;;  %483 = vst [vmem:[%s290_s7 + $0x18] sm:$0xff] %v479_v35 }
 0x373   : > { %897 = shalt.err (!%p894_p0)
}
 0x374   : > { %s898_s16 = scalar_lea.hbm %s1242_s28, 512  ;;  %s902_s6 = scalar_lea.hbm %s1291_s5, 1024 }
 0x375   : > { %p899_p2 = scmp.ne.s32.totalorder %s1242_s28, %s898_s16  ;;  %p903_p4 = scmp.lt.u32.totalorder %s1242_s28, %s1291_s5 }
 0x376   : > { %p904_p11 = scmp.lt.u32.totalorder %s902_s6, %s898_s16  ;;  %p906_p6 = scmp.lt.u32.totalorder %s898_s16, %s1242_s28 }
 0x377   : > { %p900_p8 = pnand %p899_p2, %p1309_p5 }
 0x378   : > { %p905_p1 = por %p904_p11, %p903_p4 }
 0x379   : > { %p901_p10 = pneg %p900_p8 }
 0x37a   : > { %p907_p7 = por %p906_p6, %p905_p1 }
 0x37c   : > { %p908_p9 = pnand %p907_p7, %p901_p10 }
 0x37e   : > { %911 = shalt.err (!%p908_p9)
}
 0x37f   : > { %667 = dma.vmem_to_hbm [thread:$0]  (%p1309_p5), %s1244_s17, 512, %s1242_s28, %s485_s24  }
 0x380 PF: > { %s511_s25 = sand.u32 1, %s946_s18   ;;  %p1310_p12 = scmp.ne.s32.totalorder %s1302_s23, 0 }
 0x381   : > { %p1311_p3 = scmp.ge.s32.totalorder %s958_s21, 2  ;;  %s512_s7 = scalar_lea.sflag [#allocation4], %s511_s25 }
 0x383   : > { %p687_p13 = pnand %p1311_p3, %p1310_p12 }
 0x385   : > { %941 = dma.done.wait (!%p687_p13), %s512_s7, 512  }
 0x386   : > { %943 = vsyncadd (!%p687_p13), %s512_s7, 4294966784  ;;  %p20_p0 = scmp.ge.s32.totalorder %s1142_s30, 4   ;;  %s1312_s18 = smov %s950_s19 }
 0x387   : > { %s1313_s19 = smov %s954_s20  ;;  %s1314_s20 = smov %s1153_s8 }
 0x388   : > { %s1315_s21 = smov %s1142_s30  ;;  %22 = sbr.rel (!%p20_p0) target bundleno = 7 (0x7), region = 101 }
 0x38f   :  { %517 = vsyncpa [#allocation3], 1 }
 0x390   :  { %519 = vsyncpa [#allocation3 + $0x1], 1 }
 0x391   :  { %520 = vsyncpa [#allocation6], 1 }
 0x392   :  { %521 = vsyncpa [#allocation9], 1 }
 0x393   :  { %522 = vsyncpa [#allocation4], 1 }
 0x394   :  { %524 = vsyncpa [#allocation4 + $0x1], 1 }

</bundles_post_ra>
